<compile_context>
chip_gen: v7x
topology: tpu7x:2x2x1
jax: 0.10.0
libtpu: 0.0.40
codegen_flags: <defaults>
</compile_context>

<pallas_src>
import functools
import math

import jax
import jax.numpy as jnp
from jax import lax
from jax.experimental import pallas as pl
from jax.experimental.pallas import tpu as pltpu


# ----------------------------------------------------------------------------
# Device heuristics (perf-only; correctness does not depend on them)
# ----------------------------------------------------------------------------
def _device_kind() -> str:
    try:
        return jax.devices()[0].device_kind.lower()
    except Exception:
        return ""


def _num_tensorcores_per_device() -> int:
    kind = _device_kind()
    if "lite" in kind or "v5e" in kind or "v6e" in kind:
        return 1
    if any(tag in kind for tag in ("v4", "v5p", "v7", "7x")):
        return 2
    return 1


def _has_bf16_vpu() -> bool:
    kind = _device_kind()
    return any(tag in kind for tag in ("v6", "v7", "7x"))


# ----------------------------------------------------------------------------
# Kernels
# ----------------------------------------------------------------------------
def _boundary_none_kernel(x_ref, p_ref, o_ref, *, compute_dtype):
    # p_ref: (2, C) -> row 0 = data_mean, row 1 = data_range * 0.5
    x = x_ref[...].astype(compute_dtype)
    m = p_ref[0:1, :].astype(compute_dtype)
    hr = p_ref[1:2, :].astype(compute_dtype)
    loss = jnp.maximum(jnp.abs(x - m) - hr, 0.0)
    o_ref[...] = loss.astype(o_ref.dtype)


def _boundary_mean_kernel(
    x_ref, p_ref, o_ref, acc_ref, *,
    n_inner, tr, ch, n_valid_rows, mask_from, compute_dtype, unroll,
):
    # grid = (n_outer, n_inner); axis 1 is the sequential reduction axis.
    o = pl.program_id(0)
    i = pl.program_id(1)

    @pl.when(i == 0)
    def _():
        acc_ref[...] = jnp.zeros_like(acc_ref)

    m = p_ref[0:1, :].astype(compute_dtype)
    hr = p_ref[1:2, :].astype(compute_dtype)

    g = o * n_inner + i          # global block index (all blocks are in-bounds)
    row_base = g * tr
    c = x_ref.shape[1]
    n_chunks = tr // ch

    def chunk_loss(k):
        start = pl.multiple_of(k * ch, ch)
        xk = x_ref[pl.ds(start, ch), :].astype(compute_dtype)
        return jnp.maximum(jnp.abs(xk - m) - hr, 0.0)

    def acc_unmasked(k, carry):
        loss = chunk_loss(k).astype(jnp.float32)
        acc_ref[...] += jnp.sum(loss.reshape(ch // 8, 8, c), axis=0)
        return carry

    def acc_masked(k, carry):
        loss = chunk_loss(k).astype(jnp.float32)
        rows = row_base + k * ch + lax.broadcasted_iota(jnp.int32, (ch, 1), 0)
        loss = jnp.where(rows < n_valid_rows, loss, 0.0)
        acc_ref[...] += jnp.sum(loss.reshape(ch // 8, 8, c), axis=0)
        return carry

    if mask_from is None:
        lax.fori_loop(0, n_chunks, acc_unmasked, 0, unroll=unroll)
    elif mask_from <= 0:
        lax.fori_loop(0, n_chunks, acc_masked, 0, unroll=unroll)
    else:
        @pl.when(g < mask_from)
        def _():
            lax.fori_loop(0, n_chunks, acc_unmasked, 0, unroll=unroll)

        @pl.when(g >= mask_from)
        def _():
            lax.fori_loop(0, n_chunks, acc_masked, 0, unroll=unroll)

    @pl.when(i == pl.num_programs(1) - 1)
    def _():
        # Cross-lane/sublane reduce in-kernel (XLU slot is idle here):
        # each outer partial is a single scalar.
        o_ref[...] = jnp.sum(acc_ref[...], keepdims=True)


# ----------------------------------------------------------------------------
# Tiling helpers
# ----------------------------------------------------------------------------
_TARGET_BLOCK_BYTES = 4 * 1024 * 1024   # ~4 MiB input blocks.


def _round_up(a: int, b: int) -> int:
    return (a + b - 1) // b * b


def _choose_tile_rows(n_rows: int, c: int, itemsize: int) -> int:
    target = _TARGET_BLOCK_BYTES // max(1, c * itemsize)
    target = max(8, (target // 256) * 256)
    return min(_round_up(max(n_rows, 1), 8), target)


def _compiler_params(n_block_buffers: int, block_bytes: int, semantics):
    # Explicit VMEM budget: block buffers + headroom, capped well under the
    # v7x 64 MiB physical VMEM (and above the v5e 16 MiB scoped default).
    need = n_block_buffers * block_bytes + (8 << 20)
    vmem_limit = int(min(max(need, 16 << 20), 48 << 20))
    return pltpu.CompilerParams(
        dimension_semantics=semantics, vmem_limit_bytes=vmem_limit
    )


# ----------------------------------------------------------------------------
# Wrapper (the "module")
# ----------------------------------------------------------------------------
class BoundaryLossModelPallas:
    def __init__(self, input_dim: int):
        # Deterministic parameter init, matching the PyTorch __init__
        # (non-trainable buffers).
        self.input_dim = int(input_dim)
        self.data_range = jnp.ones((1, self.input_dim), jnp.float32) * 2.0
        self.data_mean = jnp.zeros((1, self.input_dim), jnp.float32)
        self._half_range = self.data_range * 0.5   # precomputed once

        # Params packed into one (2, C) resident constant (row 0 = mean,
        # row 1 = half range).
        self._params_row = jnp.concatenate(
            [self.data_mean, self._half_range], axis=0)            # (2, D)

        d = self.input_dim
        self._ld_capable = (d <= 128) and (128 % d == 0)
        if self._ld_capable:
            rep = 128 // d
            self._params_ld = jnp.concatenate(
                [jnp.tile(self.data_mean, (1, rep)),
                 jnp.tile(self._half_range, (1, rep))], axis=0)    # (2, 128)
        else:
            self._params_ld = None
        # TODO(synk): generalize lane-dense retiling to D with 128 % D != 0
        # via a (lcm(D,128)//128, 128) parameter pattern block.

        self._num_tc = _num_tensorcores_per_device()
        self._bf16_ok = _has_bf16_vpu()

    # -- forward ---------------------------------------------------------------
    def __call__(self, x, reduction: str = "mean"):
        if reduction not in ("mean", "none"):
            raise Exception("reduction type error")

        B, D = x.shape
        assert D == self.input_dim
        n_elems = B * D

        # Layout: lane-dense (rows, 128) view when it's a free reshape,
        # otherwise the natural (B, D) row layout.  Never any padding copy.
        lane_dense = self._ld_capable and (n_elems % 128 == 0)
        if lane_dense:
            c = 128
            n_rows = n_elems // 128
            x2d = x.reshape(n_rows, c)        # free reinterpretation
            params = self._params_ld
        else:
            c = D
            n_rows = B
            x2d = x
            params = self._params_row

        compute_dtype = (
            jnp.bfloat16
            if (x.dtype == jnp.bfloat16 and self._bf16_ok)
            else jnp.float32
        )
        params = params.astype(compute_dtype)

        itemsize = jnp.dtype(x.dtype).itemsize
        tr = _choose_tile_rows(n_rows, c, itemsize)
        n_blocks = pl.cdiv(n_rows, tr)
        block_bytes = tr * c * itemsize

        if reduction == "none":
            kernel = functools.partial(
                _boundary_none_kernel, compute_dtype=compute_dtype)
            out = pl.pallas_call(
                kernel,
                out_shape=jax.ShapeDtypeStruct((n_rows, c), x.dtype),
                grid_spec=pltpu.PrefetchScalarGridSpec(
                    num_scalar_prefetch=0,
                    grid=(n_blocks,),
                    in_specs=[
                        pl.BlockSpec((tr, c), lambda i: (i, 0)),
                        pl.BlockSpec((2, c), lambda i: (0, 0)),
                    ],
                    out_specs=pl.BlockSpec((tr, c), lambda i: (i, 0)),
                ),
                compiler_params=_compiler_params(4, block_bytes, ("parallel",)),
            )(x2d, params)
            return out.reshape(B, D) if lane_dense else out

        # reduction == "mean"
        # Outer split across TensorCores only on dual-TC parts and only when it
        # divides the block count exactly (so every grid block is in-bounds).
        n_outer = 2 if (self._num_tc >= 2 and n_blocks >= 2
                        and n_blocks % 2 == 0) else 1
        n_inner = n_blocks // n_outer

        ragged = (n_rows % tr) != 0
        mask_from = (n_blocks - 1) if ragged else None

        ch = 256
        while tr % ch:
            ch //= 2                                   # tr is a multiple of 8
        n_chunks = tr // ch

        kernel = functools.partial(
            _boundary_mean_kernel,
            n_inner=n_inner, tr=tr, ch=ch,
            n_valid_rows=n_rows, mask_from=mask_from,
            compute_dtype=compute_dtype,
            unroll=(n_chunks <= 8),
        )

        partials = pl.pallas_call(
            kernel,
            out_shape=jax.ShapeDtypeStruct((n_outer, 1, 1), jnp.float32),
            grid_spec=pltpu.PrefetchScalarGridSpec(
                num_scalar_prefetch=0,
                grid=(n_outer, n_inner),
                in_specs=[
                    pl.BlockSpec((tr, c), lambda o, i: (o * n_inner + i, 0)),
                    pl.BlockSpec((2, c), lambda o, i: (0, 0)),
                ],
                out_specs=pl.BlockSpec((None, 1, 1), lambda o, i: (o, 0, 0)),
                scratch_shapes=[pltpu.VMEM((8, c), jnp.float32)],
            ),
            compiler_params=_compiler_params(
                2, block_bytes, ("parallel", "arbitrary")),
        )(x2d, params)

        total = jnp.sum(partials) * (1.0 / float(n_elems))
        return total.astype(x.dtype)


# ----------------------------------------------------------------------------
# Pure-JAX reference (for in-script correctness check)
# ----------------------------------------------------------------------------
def _reference(x, data_mean, data_range, reduction="mean"):
    loss = jnp.maximum(jnp.abs(x - data_mean) - data_range * 0.5, 0.0)
    if reduction == "none":
        return loss
    return jnp.mean(loss)


if __name__ == "__main__":
    key = jax.random.PRNGKey(0)
    batch, input_dim = 16, 32   # small shapes implied by the (batch, input_dim) forward
    x = jax.random.normal(key, (batch, input_dim), dtype=jnp.float32) * 3.0

    model = BoundaryLossModelPallas(input_dim)

    # mean reduction (default path)
    loss_mean = jax.block_until_ready(model(x, reduction="mean"))
    # elementwise ('none') reduction
    loss_none = jax.block_until_ready(model(x, reduction="none"))

    ref_mean = _reference(x, model.data_mean, model.data_range, "mean")
    ref_none = _reference(x, model.data_mean, model.data_range, "none")

    assert loss_none.shape == x.shape
    assert jnp.allclose(loss_none, ref_none, atol=1e-6, rtol=1e-6)
    assert jnp.allclose(loss_mean, ref_mean, atol=1e-6, rtol=1e-6)

    # Extra small shapes exercising the ragged lane-dense path (36*32 % 128 == 0,
    # rows % tile != 0) and the row-layout fallback (13*32 % 128 != 0).
    for b in (36, 13):
        xb = jax.random.normal(jax.random.PRNGKey(b), (b, input_dim),
                               dtype=jnp.float32) * 3.0
        rm = _reference(xb, model.data_mean, model.data_range, "mean")
        rn = _reference(xb, model.data_mean, model.data_range, "none")
        om = jax.block_until_ready(model(xb, "mean"))
        on = jax.block_until_ready(model(xb, "none"))
        assert on.shape == xb.shape
        assert jnp.allclose(om, rm, atol=1e-6, rtol=1e-6)
        assert jnp.allclose(on, rn, atol=1e-6, rtol=1e-6)

    print("KERNEL_OK")
</pallas_src>

<mosaic_0001>
module attributes {stable_mosaic.version = 11 : i64} {
  func.func @_boundary_mean_kernel(%arg0: i32, %arg1: i32, %arg2: memref<8x128xf32, #tpu.memory_space<vmem>>, %arg3: memref<2x128xf32, #tpu.memory_space<vmem>>, %arg4: memref<1x1x1xf32, #tpu.memory_space<vmem>>, %arg5: memref<8x128xf32, #tpu.memory_space<vmem>>) attributes {dimension_semantics = [#tpu.dimension_semantics<parallel>, #tpu.dimension_semantics<arbitrary>], iteration_bounds = array<i64: 1, 1>, scalar_prefetch = 0 : i64, scratch_operands = 1 : i64, tpu.core_type = #tpu.core_type<tc>, window_params = [{transform_indices = @transform_0, window_bounds = array<i64: 8, 128>}, {pipeline_mode = #tpu.pipeline_mode<synchronous>, transform_indices = @transform_1, window_bounds = array<i64: 2, 128>}, {transform_indices = @transform_2, window_bounds = array<i64: 1, 1, 1>}]} {
    %c0_i32 = arith.constant 0 : i32
    %0 = arith.cmpi eq, %arg1, %c0_i32 : i32
    %1 = arith.extui %0 : i1 to i32
    %c0_i32_0 = arith.constant 0 : i32
    %2 = arith.cmpi ne, %1, %c0_i32_0 : i32
    scf.if %2 {
      %cst_16 = arith.constant 0.000000e+00 : f32
      %38 = vector.broadcast %cst_16 : f32 to vector<8x128xf32>
      %c0_17 = arith.constant 0 : index
      %c0_18 = arith.constant 0 : index
      %39 = vector.load %arg5[%c0_17, %c0_18] : memref<8x128xf32, #tpu.memory_space<vmem>>, vector<8x128xf32>
      tpu.vector_store %arg5[%c0_17, %c0_18], %38 {strides = array<i32>} : memref<8x128xf32, #tpu.memory_space<vmem>>, vector<8x128xf32>,
    } else {
    }
    %c0 = arith.constant 0 : index
    %c0_1 = arith.constant 0 : index
    %3 = vector.load %arg3[%c0, %c0_1] : memref<2x128xf32, #tpu.memory_space<vmem>>, vector<1x128xf32>
    %c1 = arith.constant 1 : index
    %c0_2 = arith.constant 0 : index
    %4 = vector.load %arg3[%c1, %c0_2] : memref<2x128xf32, #tpu.memory_space<vmem>>, vector<1x128xf32>
    %c1_i32 = arith.constant 1 : i32
    %5 = arith.muli %arg0, %c1_i32 : i32
    %6 = arith.addi %5, %arg1 : i32
    %c8_i32 = arith.constant 8 : i32
    %7 = arith.muli %6, %c8_i32 : i32
    %c0_i32_3 = arith.constant 0 : i32
    %c8_i32_4 = arith.constant 8 : i32
    %8 = arith.muli %c0_i32_3, %c8_i32_4 : i32
    %9 = tpu.assume_multiple %8, 8 : i32
    %10 = arith.index_cast %9 : i32 to index
    %c0_5 = arith.constant 0 : index
    %11 = vector.load %arg2[%10, %c0_5] : memref<8x128xf32, #tpu.memory_space<vmem>>, vector<8x128xf32>
    %12 = vector.broadcast %3 : vector<1x128xf32> to vector<8x128xf32>
    %13 = arith.subf %11, %12 : vector<8x128xf32>
    %14 = math.absf %13 : vector<8x128xf32>
    %15 = vector.broadcast %4 : vector<1x128xf32> to vector<8x128xf32>
    %16 = arith.subf %14, %15 : vector<8x128xf32>
    %cst = arith.constant 0.000000e+00 : f32
    %17 = vector.broadcast %cst : f32 to vector<8x128xf32>
    %18 = arith.maximumf %16, %17 : vector<8x128xf32>
    %c8_i32_6 = arith.constant 8 : i32
    %19 = arith.muli %c0_i32_3, %c8_i32_6 : i32
    %20 = arith.addi %7, %19 : i32
    %21 = tpu.iota {dimensions = array<i32: 0>} : vector<8x1xi32>
    %22 = vector.broadcast %20 : i32 to vector<8x1xi32>
    %23 = arith.addi %22, %21 : vector<8x1xi32>
    %c4_i32 = arith.constant 4 : i32
    %24 = vector.broadcast %c4_i32 : i32 to vector<8x1xi32>
    %25 = arith.cmpi slt, %23, %24 : vector<8x1xi32>
    %cst_7 = arith.constant 0.000000e+00 : f32
    %26 = vector.shape_cast %25 : vector<8x1xi1> to vector<8x1xi1>
    %27 = vector.broadcast %26 : vector<8x1xi1> to vector<8x128xi1>
    %28 = vector.broadcast %cst_7 : f32 to vector<8x128xf32>
    %29 = arith.select %27, %18, %28 : vector<8x128xi1>, vector<8x128xf32>
    %c0_8 = arith.constant 0 : index
    %c0_9 = arith.constant 0 : index
    %30 = vector.load %arg5[%c0_8, %c0_9] : memref<8x128xf32, #tpu.memory_space<vmem>>, vector<8x128xf32>
    %31 = vector.shape_cast %29 : vector<8x128xf32> to vector<1x8x128xf32>
    %cst_10 = arith.constant dense<0.000000e+00> : vector<8x128xf32>
    %32 = vector.multi_reduction <add>, %31, %cst_10 [0] : vector<1x8x128xf32> to vector<8x128xf32>
    %33 = arith.addf %30, %32 : vector<8x128xf32>
    %c0_11 = arith.constant 0 : index
    %c0_12 = arith.constant 0 : index
    %34 = vector.load %arg5[%c0_11, %c0_12] : memref<8x128xf32, #tpu.memory_space<vmem>>, vector<8x128xf32>
    tpu.vector_store %arg5[%c0_11, %c0_12], %33 {strides = array<i32>} : memref<8x128xf32, #tpu.memory_space<vmem>>, vector<8x128xf32>,
    %c1_i32_13 = arith.constant 1 : i32
    %c0_i32_14 = arith.constant 0 : i32
    %35 = arith.cmpi eq, %arg1, %c0_i32_14 : i32
    %36 = arith.extui %35 : i1 to i32
    %c0_i32_15 = arith.constant 0 : i32
    %37 = arith.cmpi ne, %36, %c0_i32_15 : i32
    scf.if %37 {
      %c0_16 = arith.constant 0 : index
      %c0_17 = arith.constant 0 : index
      %38 = vector.load %arg5[%c0_16, %c0_17] : memref<8x128xf32, #tpu.memory_space<vmem>>, vector<8x128xf32>
      %39 = vector.shape_cast %38 : vector<8x128xf32> to vector<1x8x128xf32>
      %cst_18 = arith.constant dense<0.000000e+00> : vector<1xf32>
      %40 = vector.multi_reduction <add>, %39, %cst_18 [1, 2] : vector<1x8x128xf32> to vector<1xf32>
      %41 = vector.shape_cast %40 : vector<1xf32> to vector<1x1x1xf32>
      %42 = vector.extract %41[0, 0, 0] : f32 from vector<1x1x1xf32>
      %43 = vector.broadcast %42 : f32 to vector<1x1xf32>
      %c0_19 = arith.constant 0 : index
      %c0_20 = arith.constant 0 : index
      %c0_21 = arith.constant 0 : index
      %44 = vector.load %arg4[%c0_19, %c0_20, %c0_21] : memref<1x1x1xf32, #tpu.memory_space<vmem>>, vector<1x1x1xf32>
      %45 = vector.shape_cast %44 : vector<1x1x1xf32> to vector<1x1xf32>
      %46 = vector.shape_cast %43 : vector<1x1xf32> to vector<1x1x1xf32>
      tpu.vector_store %arg4[%c0_19, %c0_20, %c0_21], %46 {strides = array<i32>} : memref<1x1x1xf32, #tpu.memory_space<vmem>>, vector<1x1x1xf32>,
    } else {
    }
    return
  }
  func.func @transform_0(%arg0: i32, %arg1: i32) -> (i32, i32) {
    %c1_i32 = arith.constant 1 : i32
    %0 = arith.muli %arg0, %c1_i32 : i32
    %1 = arith.addi %0, %arg1 : i32
    %c0_i32 = arith.constant 0 : i32
    %c0_i32_0 = arith.constant 0 : i32
    return %1, %c0_i32 : i32, i32
  }
  func.func @transform_1(%arg0: i32, %arg1: i32) -> (i32, i32) {
    %c0_i32 = arith.constant 0 : i32
    %c0_i32_0 = arith.constant 0 : i32
    %c0_i32_1 = arith.constant 0 : i32
    return %c0_i32, %c0_i32_0 : i32, i32
  }
  func.func @transform_2(%arg0: i32, %arg1: i32) -> (i32, i32, i32) {
    %c0_i32 = arith.constant 0 : i32
    %c0_i32_0 = arith.constant 0 : i32
    %c0_i32_1 = arith.constant 0 : i32
    return %arg0, %c0_i32, %c0_i32_0 : i32, i32, i32
  }
}

</mosaic_0001>

<bundles_post_ra>
// kernel: tpu_custom_call.1
= control target key start
LH: loop header
LB: loop body
LE: loop exit
PB: predicated region body
PF: predicated region fallthrough
CT: control target
= control target key end

     0   :  { %7 = vsyncpa [#allocation4], 0  ;;  %s208_s0 = inlined_call_operand.hbm [shape: f32[4,128], index: 0, kind: input, shape index: {}]   ;;  %s209_s1 = inlined_call_operand.vmem [shape: f32[2,128], index: 1, kind: input, shape index: {}]   ;;  %s210_s2 = inlined_call_operand.hbm [shape: f32[1,1,1], index: 2, kind: output, shape index: {}]  }
   0x1   :  { %8 = vsyncpa [#allocation5], 0 }
   0x2   :  { %17 = vsyncadd [#allocation4], 64  ;;  %s159_s9 = smov [#allocation3]   ;;  %s111_s13 = scalar_lea.hbm %s208_s0, 64 }
   0x3   :  { %s22_s10 = sshll.u32 %s159_s9, 4  ;;  %p112_p0 = scmp.ne.s32.totalorder %s208_s0, %s111_s13  ;;  %s23_s10 = int_to_ptr.vmem [resolvable:$true] %s22_s10 }
   0x4   :  { %p115_p1 = scmp.lt.u32.totalorder %s111_s13, %s208_s0 }
   0x6   :  { %p117_p2 = pnand %p115_p1, %p112_p0 }
   0x8   :  { %120 = shalt.err (!%p117_p2)
}
   0x9   :  { %s121_s18 = scalar_lea.vmem %s23_s10, 64  ;;  %s125_s19 = scalar_lea.vmem %s23_s10, 128 }
   0xa   :  { %p122_p3 = scmp.ne.s32.totalorder %s23_s10, %s121_s18  ;;  %p126_p4 = scmp.lt.s32.totalorder %s23_s10, %s23_s10 }
   0xb   :  { %p127_p5 = scmp.lt.s32.totalorder %s125_s19, %s121_s18 }
   0xd   :  { %p128_p6 = por %p127_p5, %p126_p4 }
   0xf   :  { %p129_p7 = pnand %p128_p6, %p122_p3 }
  0x11   :  { %132 = shalt.err (!%p129_p7)
}
  0x12   :  { %s160_s20 = smov 64   ;;  %s161_s21 = smov 4  }
  0x13   :  { %28 = dma.hbm_to_vmem [thread:$0]  %s208_s0, 64, %s23_s10, [#allocation4], %s160_s20, %s160_s20, %s161_s21  }
  0x14   :  { %155 = dma.done.wait [#allocation4], 128  }
  0x15   :  { %156 = vsyncadd [#allocation4], 4294967168  ;;  %v60_v0 = vlaneseq  ;;  %v103_v1 = vld [vmem:[%s209_s1] ss:$0 sm:$0xff]  ;;  %v104_v4 = vld [vmem:[%s209_s1 + $0x1] ss:$0 sm:$0xff] }
  0x16   :  { %v47_v2 = vld [vmem:[#allocation3] sm:$0xff]  ;;  %s162_s0 = smov [#allocation6]   ;;  %vm86_vm1 = vcmask 0  }
  0x17   :  { %v52_v3 = vsub.f32 %v47_v2, %v103_v1  ;;  %v61_v5 = vshrl.u32 %v60_v0, 7  ;;  %s94_s28 = sshll.u32 %s162_s0, 4  ;;  %s95_s28 = int_to_ptr.vmem [resolvable:$true] %s94_s28 }
  0x18   :  { %s133_s1 = scalar_lea.vmem %s95_s28, 16  ;;  %s137_s30 = scalar_lea.vmem %s95_s28, 32 }
  0x19   :  { %v53_v6 = vand.u32 2147483647, %v52_v3  ;;  %vm64_vm0 = vcmp.lt.s32.totalorder %v61_v5, 4  ;;  %p134_p8 = scmp.ne.s32.totalorder %s95_s28, %s133_s1  ;;  %p138_p9 = scmp.lt.s32.totalorder %s95_s28, %s95_s28 }
  0x1a   :  { %p139_p10 = scmp.lt.s32.totalorder %s137_s30, %s133_s1 }
  0x1b   :  { %v58_v7 = vsub.f32 %v53_v6, %v104_v4 }
  0x1c   :  { %p140_p11 = por %p139_p10, %p138_p9 }
  0x1d   :  { %v59_v8 = vmax.f32 %v58_v7, 0.0 }
  0x1e   :  { %p141_p12 = pnand %p140_p11, %p134_p8 }
  0x1f   :  { %v67_v9 = vsel %vm64_vm0, %v59_v8, 0.0 }
  0x20   :  { %76 = vadd.xlane.f32.xlu0 %v67_v9 }
  0xad   :  { %v77_v10 = vpop.xlane.xlu0 %76 }
  0xae   :  { %v78_v11 = vrot.slane %v77_v10, 4 }
  0xb0   :  { %v79_v12 = vadd.f32 %v78_v11, %v77_v10 }
  0xb2   :  { %v80_v13 = vrot.slane %v79_v12, 2 }
  0xb4   :  { %v81_v14 = vadd.f32 %v80_v13, %v79_v12 }
  0xb6   :  { %v82_v15 = vrot.slane %v81_v14, 1 }
  0xb8   :  { %v83_v16 = vadd.f32 %v82_v15, %v81_v14 }
  0xba   :  { %105 = vpush %v83_v16 }
  0xeb   :  { %s106_s29 = spop %105 }
  0xec   :  { %v85_v17 = vstv %s106_s29 }
  0xed   :  { %87 = vst.msk [vmem:[#allocation6] sm:$0x1] %vm86_vm1, %v85_v17 }
  0xee   :  { %144 = shalt.err (!%p141_p12)
}
  0xef   :  { %s145_s5 = scalar_lea.hbm %s210_s2, 16 }
  0xf0   :  { %p146_p13 = scmp.ne.s32.totalorder %s210_s2, %s145_s5  ;;  %p149_p0 = scmp.lt.u32.totalorder %s145_s5, %s210_s2 }
  0xf2   :  { %p151_p1 = pnand %p149_p0, %p146_p13 }
  0xf4   :  { %154 = shalt.err (!%p151_p1)
}
  0xf5   :  { %97 = dma.vmem_to_hbm [thread:$0]  %s95_s28, 16, %s210_s2, [#allocation5]  }
  0xf6   :  { %157 = dma.done.wait [#allocation5], 16  }
  0xf7   :  { %158 = vsyncadd [#allocation5], 4294967280 }
  0xf8   :  { %101 = vsyncpa [#allocation4], 1 }
  0xf9   :  { %102 = vsyncpa [#allocation5], 1 }

</bundles_post_ra>
